<compile_context>
chip_gen: v5e
topology: v5e:2x2
jax: 0.10.0
libtpu: 0.0.40
codegen_flags: <defaults>
</compile_context>

<pallas_src>
import functools

import jax
import jax.numpy as jnp
from jax.experimental import pallas as pl
from jax.experimental.pallas import tpu as pltpu


VMEM_LIMIT = 32 * 1024 * 1024  # safe on v5e/v6e/v7x (<= scoped/physical on every gen)


def _pick_tile(dim, target):
    """Largest tile <= target that divides dim, else the full dim (always legal)."""
    if dim <= target:
        return dim
    for t in (target, 512, 256, 128):
        if t <= target and dim % t == 0:
            return t
    return dim


# --------------------------- tiled matmul (+bias, +gelu) ---------------------------

def _matmul_bias_kernel(x_ref, w_ref, b_ref, o_ref, acc_ref, *, act):
    @pl.when(pl.program_id(2) == 0)
    def _():
        acc_ref[...] = jnp.zeros_like(acc_ref)

    acc_ref[...] += jnp.dot(x_ref[...], w_ref[...],
                            preferred_element_type=jnp.float32)

    @pl.when(pl.program_id(2) == pl.num_programs(2) - 1)
    def _():
        y = acc_ref[...] + b_ref[...]
        if act == "gelu":
            # TODO(synk): PyTorch/MPNet default is exact erf GELU; tanh approximation kept
            # for robust Mosaic lowering.
            y = jax.nn.gelu(y, approximate=True)
        o_ref[...] = y


def matmul_bias(x, w, b, act="none"):
    M, K = x.shape
    N = w.shape[1]
    tm = _pick_tile(M, 256)
    tn = _pick_tile(N, 256)
    tk = _pick_tile(K, 512)
    xb = x.astype(jnp.bfloat16)
    wb = w.astype(jnp.bfloat16)
    return pl.pallas_call(
        functools.partial(_matmul_bias_kernel, act=act),
        grid_spec=pltpu.PrefetchScalarGridSpec(
            num_scalar_prefetch=0,
            grid=(M // tm, N // tn, K // tk),
            in_specs=[
                pl.BlockSpec((tm, tk), lambda i, j, k: (i, k)),
                pl.BlockSpec((tk, tn), lambda i, j, k: (k, j)),
                pl.BlockSpec((1, tn), lambda i, j, k: (0, j)),
            ],
            out_specs=pl.BlockSpec((tm, tn), lambda i, j, k: (i, j)),
            scratch_shapes=[pltpu.VMEM((tm, tn), jnp.float32)],
        ),
        out_shape=jax.ShapeDtypeStruct((M, N), jnp.float32),
        compiler_params=pltpu.CompilerParams(
            dimension_semantics=("parallel", "parallel", "arbitrary"),
            vmem_limit_bytes=VMEM_LIMIT,
        ),
    )(xb, wb, b.reshape(1, N).astype(jnp.float32))


# ----------------- fused matmul + bias + residual + layernorm (epilogue) -----------------

def _matmul_res_ln_kernel(x_ref, w_ref, b_ref, r_ref, g_ref, bt_ref, o_ref, acc_ref):
    @pl.when(pl.program_id(1) == 0)
    def _():
        acc_ref[...] = jnp.zeros_like(acc_ref)

    acc_ref[...] += jnp.dot(x_ref[...], w_ref[...],
                            preferred_element_type=jnp.float32)

    @pl.when(pl.program_id(1) == pl.num_programs(1) - 1)
    def _():
        y = acc_ref[...] + b_ref[...] + r_ref[...]
        mu = jnp.mean(y, axis=-1, keepdims=True)
        var = jnp.mean((y - mu) ** 2, axis=-1, keepdims=True)
        yn = (y - mu) * jax.lax.rsqrt(var + 1e-5)
        o_ref[...] = yn * g_ref[...] + bt_ref[...]


def matmul_bias_residual_ln(x, w, b, res, gamma, beta):
    """(x @ w + b + res) -> layernorm over last dim. N kept untiled so LN sees a full row."""
    M, K = x.shape
    N = w.shape[1]
    tm = _pick_tile(M, 256)
    tk = _pick_tile(K, 512)
    xb = x.astype(jnp.bfloat16)
    wb = w.astype(jnp.bfloat16)
    return pl.pallas_call(
        _matmul_res_ln_kernel,
        grid_spec=pltpu.PrefetchScalarGridSpec(
            num_scalar_prefetch=0,
            grid=(M // tm, K // tk),
            in_specs=[
                pl.BlockSpec((tm, tk), lambda i, k: (i, k)),
                pl.BlockSpec((tk, N), lambda i, k: (k, 0)),
                pl.BlockSpec((1, N), lambda i, k: (0, 0)),
                pl.BlockSpec((tm, N), lambda i, k: (i, 0)),
                pl.BlockSpec((1, N), lambda i, k: (0, 0)),
                pl.BlockSpec((1, N), lambda i, k: (0, 0)),
            ],
            out_specs=pl.BlockSpec((tm, N), lambda i, k: (i, 0)),
            scratch_shapes=[pltpu.VMEM((tm, N), jnp.float32)],
        ),
        out_shape=jax.ShapeDtypeStruct((M, N), jnp.float32),
        compiler_params=pltpu.CompilerParams(
            dimension_semantics=("parallel", "arbitrary"),
            vmem_limit_bytes=VMEM_LIMIT,
        ),
    )(xb, wb, b.reshape(1, N).astype(jnp.float32), res,
      gamma.reshape(1, N), beta.reshape(1, N))


# --------------------------------- attention ---------------------------------

def _attn_kernel(qkv_ref, m_ref, o_ref, *, nh, dh):
    qkv = qkv_ref[0]                  # (S, 3D) f32
    m = m_ref[0]                      # (1, S) -- 1.0 for valid key positions
    D = nh * dh
    scale = 1.0 / jnp.sqrt(jnp.float32(dh))
    for h in range(nh):               # static head loop, all heads in one grid step
        q = qkv[:, h * dh:(h + 1) * dh].astype(jnp.bfloat16)
        k = qkv[:, D + h * dh:D + (h + 1) * dh].astype(jnp.bfloat16)
        v = qkv[:, 2 * D + h * dh:2 * D + (h + 1) * dh].astype(jnp.bfloat16)
        s = jax.lax.dot_general(q, k, (((1,), (1,)), ((), ())),
                                preferred_element_type=jnp.float32) * scale  # (S, S)
        s = jnp.where(m > 0.5, s, jnp.float32(-1e9))        # mask key axis
        s = s - jnp.max(s, axis=-1, keepdims=True)
        p = jnp.exp(s)
        p = p / jnp.sum(p, axis=-1, keepdims=True)
        o = jnp.dot(p.astype(jnp.bfloat16), v, preferred_element_type=jnp.float32)
        o_ref[0, :, h * dh:(h + 1) * dh] = o


def multihead_attention(qkv3, mask3, nh):
    # qkv3: (B', S, 3D); mask3: (B', 1, S)  -- no head replication of the mask needed
    Bp, S, threeD = qkv3.shape
    D = threeD // 3
    dh = D // nh
    return pl.pallas_call(
        functools.partial(_attn_kernel, nh=nh, dh=dh),
        grid=(Bp,),
        in_specs=[
            pl.BlockSpec((1, S, threeD), lambda i: (i, 0, 0)),
            pl.BlockSpec((1, 1, S), lambda i: (i, 0, 0)),
        ],
        out_specs=pl.BlockSpec((1, S, D), lambda i: (i, 0, 0)),
        out_shape=jax.ShapeDtypeStruct((Bp, S, D), jnp.float32),
        compiler_params=pltpu.CompilerParams(
            dimension_semantics=("parallel",),
            vmem_limit_bytes=VMEM_LIMIT,
        ),
    )(qkv3, mask3)


# ------------------------ embedding add + layernorm (no zero residual) ------------------------

def _embed_ln_kernel(tok_ref, pos_ref, g_ref, b_ref, o_ref):
    x = tok_ref[0] + pos_ref[...]                       # (S, D)
    mu = jnp.mean(x, axis=-1, keepdims=True)
    var = jnp.mean((x - mu) ** 2, axis=-1, keepdims=True)
    xn = (x - mu) * jax.lax.rsqrt(var + 1e-5)
    o_ref[0] = xn * g_ref[...] + b_ref[...]


def embed_layernorm(tok, pos, gamma, beta):
    Bp, S, D = tok.shape
    return pl.pallas_call(
        _embed_ln_kernel,
        grid=(Bp,),
        in_specs=[
            pl.BlockSpec((1, S, D), lambda i: (i, 0, 0)),
            pl.BlockSpec((S, D), lambda i: (0, 0)),
            pl.BlockSpec((1, D), lambda i: (0, 0)),
            pl.BlockSpec((1, D), lambda i: (0, 0)),
        ],
        out_specs=pl.BlockSpec((1, S, D), lambda i: (i, 0, 0)),
        out_shape=jax.ShapeDtypeStruct((Bp, S, D), jnp.float32),
        compiler_params=pltpu.CompilerParams(
            dimension_semantics=("parallel",),
            vmem_limit_bytes=VMEM_LIMIT,
        ),
    )(tok, pos, gamma.reshape(1, D), beta.reshape(1, D))


# ----------------------- fused mean pooling + cosine similarity -----------------------

def _pool_cos_kernel(e_ref, m_ref, o_ref, *, half):
    e = e_ref[...]                                      # (2B, S, D)
    m = m_ref[...]                                      # (2B, S)
    summed = jnp.sum(e * m[:, :, None], axis=1)         # masked token sum -> (2B, D)
    cnt = jnp.sum(m, axis=1, keepdims=True)             # (2B, 1)
    pooled = summed / jnp.maximum(cnt, 1e-9)            # torch.clamp(..., min=1e-9)
    a = pooled[:half]
    b = pooled[half:]
    dot = jnp.sum(a * b, axis=-1, keepdims=True)
    na = jnp.sqrt(jnp.sum(a * a, axis=-1, keepdims=True))
    nb = jnp.sqrt(jnp.sum(b * b, axis=-1, keepdims=True))
    # torch.nn.CosineSimilarity(dim=1, eps=1e-4): x1.x2 / max(||x1||*||x2||, eps)
    o_ref[...] = dot / jnp.maximum(na * nb, 1e-4)


def pool_and_cosine(hidden, mask_f, half):
    # hidden: (2B, S, D) stacked [a..., b...]; mask_f: (2B, S)
    out = pl.pallas_call(
        functools.partial(_pool_cos_kernel, half=half),
        out_shape=jax.ShapeDtypeStruct((half, 1), jnp.float32),
        compiler_params=pltpu.CompilerParams(vmem_limit_bytes=VMEM_LIMIT),
    )(hidden, mask_f)
    return out.reshape(half)


# -------------------------- synthetic encoder glue --------------------------

def init_params(key, vocab, max_len, D, nh, ffn, n_layers):
    ks = jax.random.split(key, 4 + n_layers)
    params = {
        "tok_emb": 0.02 * jax.random.normal(ks[0], (vocab, D), jnp.float32),
        "pos_emb": 0.02 * jax.random.normal(ks[1], (max_len, D), jnp.float32),
        "emb_ln_g": jnp.ones((D,), jnp.float32),
        "emb_ln_b": jnp.zeros((D,), jnp.float32),
        "layers": [],
        "nh": nh,
    }
    for li in range(n_layers):
        lk = jax.random.split(ks[4 + li], 6)
        wq = 0.02 * jax.random.normal(lk[0], (D, D), jnp.float32)
        wk = 0.02 * jax.random.normal(lk[1], (D, D), jnp.float32)
        wv = 0.02 * jax.random.normal(lk[2], (D, D), jnp.float32)
        layer = {
            # fused QKV projection weights (bf16 MXU operands)
            "w_qkv": jnp.concatenate([wq, wk, wv], axis=1).astype(jnp.bfloat16),
            "b_qkv": jnp.zeros((3 * D,), jnp.float32),
            "wo": (0.02 * jax.random.normal(lk[3], (D, D), jnp.float32)).astype(jnp.bfloat16),
            "bo": jnp.zeros((D,), jnp.float32),
            "ln1_g": jnp.ones((D,), jnp.float32),
            "ln1_b": jnp.zeros((D,), jnp.float32),
            "w1": (0.02 * jax.random.normal(lk[4], (D, ffn), jnp.float32)).astype(jnp.bfloat16),
            "b1": jnp.zeros((ffn,), jnp.float32),
            "w2": (0.02 * jax.random.normal(lk[5], (ffn, D), jnp.float32)).astype(jnp.bfloat16),
            "b2": jnp.zeros((D,), jnp.float32),
            "ln2_g": jnp.ones((D,), jnp.float32),
            "ln2_b": jnp.zeros((D,), jnp.float32),
        }
        params["layers"].append(layer)
    return params


def encoder_layer(x, mask3, lp, nh, Bp, S):
    # x: (M, D) flat hidden, M = Bp*S
    M, D = x.shape
    qkv = matmul_bias(x, lp["w_qkv"], lp["b_qkv"])                    # (M, 3D) fused QKV
    attn = multihead_attention(qkv.reshape(Bp, S, 3 * D), mask3, nh)  # (Bp, S, D)
    h1 = matmul_bias_residual_ln(attn.reshape(M, D), lp["wo"], lp["bo"],
                                 x, lp["ln1_g"], lp["ln1_b"])         # fused proj+res+LN
    ff = matmul_bias(h1, lp["w1"], lp["b1"], act="gelu")              # (M, FFN)
    h2 = matmul_bias_residual_ln(ff, lp["w2"], lp["b2"],
                                 h1, lp["ln2_g"], lp["ln2_b"])        # fused w2+res+LN
    return h2


def encode(params, input_ids, attention_mask):
    # input_ids, attention_mask: (B', S) -- stacked sentence pair
    Bp, S = input_ids.shape
    D = params["tok_emb"].shape[1]
    mask_f = attention_mask.astype(jnp.float32)
    mask3 = mask_f.reshape(Bp, 1, S)

    tok = params["tok_emb"][input_ids]                                # (B', S, D) glue gather
    h = embed_layernorm(tok, params["pos_emb"][:S],
                        params["emb_ln_g"], params["emb_ln_b"])       # (B', S, D)

    x = h.reshape(Bp * S, D)
    for lp in params["layers"]:
        x = encoder_layer(x, mask3, lp, params["nh"], Bp, S)
    return x.reshape(Bp, S, D)


def bimodel_forward(params, input_ids, attention_mask):
    # input_ids, attention_mask: (2, B, S) -- a pair of token batches (a, b)
    two, B, S = input_ids.shape
    ids = input_ids.reshape(two * B, S)                               # stack pair -> one batch
    msk = attention_mask.reshape(two * B, S)
    hidden = encode(params, ids, msk)                                 # (2B, S, D), one pass
    return pool_and_cosine(hidden, msk.astype(jnp.float32), half=B)   # (B,)


# ---------------------------------- main ------------------------------------

if __name__ == "__main__":
    B, S, D, NH, FFN, VOCAB, LAYERS = 2, 8, 32, 4, 64, 64, 2

    key = jax.random.PRNGKey(0)
    k_param, k_ids = jax.random.split(key)

    params = init_params(k_param, vocab=VOCAB, max_len=S, D=D, nh=NH,
                         ffn=FFN, n_layers=LAYERS)

    input_ids = jax.random.randint(k_ids, (2, B, S), 0, VOCAB, dtype=jnp.int32)
    lengths = jnp.array([[S, 5], [6, S]], dtype=jnp.int32)            # (2, B) valid lengths
    attention_mask = (jnp.arange(S, dtype=jnp.int32)[None, None, :]
                      < lengths[:, :, None]).astype(jnp.int32)        # (2, B, S)

    pred = bimodel_forward(params, input_ids, attention_mask)
    pred = jax.block_until_ready(pred)

    assert pred.shape == (B,)
    assert bool(jnp.all(jnp.isfinite(pred)))
    assert bool(jnp.all(jnp.abs(pred) <= 1.0 + 1e-5))
    print("KERNEL_OK")
</pallas_src>

<mosaic_0001>
module attributes {stable_mosaic.version = 11 : i64} {
  func.func @_embed_ln_kernel(%arg0: i32, %arg1: memref<1x8x32xf32, #tpu.memory_space<vmem>>, %arg2: memref<8x32xf32, #tpu.memory_space<vmem>>, %arg3: memref<1x32xf32, #tpu.memory_space<vmem>>, %arg4: memref<1x32xf32, #tpu.memory_space<vmem>>, %arg5: memref<1x8x32xf32, #tpu.memory_space<vmem>>) attributes {dimension_semantics = [#tpu.dimension_semantics<parallel>], iteration_bounds = array<i64: 4>, scalar_prefetch = 0 : i64, scratch_operands = 0 : i64, tpu.core_type = #tpu.core_type<tc>, window_params = [{transform_indices = @transform_0, window_bounds = array<i64: 1, 8, 32>}, {pipeline_mode = #tpu.pipeline_mode<synchronous>, transform_indices = @transform_1, window_bounds = array<i64: 8, 32>}, {pipeline_mode = #tpu.pipeline_mode<synchronous>, transform_indices = @transform_2, window_bounds = array<i64: 1, 32>}, {pipeline_mode = #tpu.pipeline_mode<synchronous>, transform_indices = @transform_3, window_bounds = array<i64: 1, 32>}, {transform_indices = @transform_4, window_bounds = array<i64: 1, 8, 32>}]} {
    %c0 = arith.constant 0 : index
    %c0_0 = arith.constant 0 : index
    %c0_1 = arith.constant 0 : index
    %0 = vector.load %arg1[%c0, %c0_0, %c0_1] : memref<1x8x32xf32, #tpu.memory_space<vmem>>, vector<1x8x32xf32>
    %1 = vector.shape_cast %0 : vector<1x8x32xf32> to vector<8x32xf32>
    %c0_2 = arith.constant 0 : index
    %c0_3 = arith.constant 0 : index
    %2 = vector.load %arg2[%c0_2, %c0_3] : memref<8x32xf32, #tpu.memory_space<vmem>>, vector<8x32xf32>
    %3 = arith.addf %1, %2 : vector<8x32xf32>
    %cst = arith.constant dense<0.000000e+00> : vector<8xf32>
    %4 = vector.multi_reduction <add>, %3, %cst [1] : vector<8x32xf32> to vector<8xf32>
    %5 = vector.shape_cast %4 : vector<8xf32> to vector<8x1xf32>
    %cst_4 = arith.constant 3.200000e+01 : f32
    %6 = vector.broadcast %cst_4 : f32 to vector<8x1xf32>
    %7 = arith.divf %5, %6 : vector<8x1xf32>
    %8 = vector.broadcast %7 : vector<8x1xf32> to vector<8x32xf32>
    %9 = arith.subf %3, %8 : vector<8x32xf32>
    %10 = arith.mulf %9, %9 : vector<8x32xf32>
    %cst_5 = arith.constant dense<0.000000e+00> : vector<8xf32>
    %11 = vector.multi_reduction <add>, %10, %cst_5 [1] : vector<8x32xf32> to vector<8xf32>
    %12 = vector.shape_cast %11 : vector<8xf32> to vector<8x1xf32>
    %cst_6 = arith.constant 3.200000e+01 : f32
    %13 = vector.broadcast %cst_6 : f32 to vector<8x1xf32>
    %14 = arith.divf %12, %13 : vector<8x1xf32>
    %15 = vector.broadcast %7 : vector<8x1xf32> to vector<8x32xf32>
    %16 = arith.subf %3, %15 : vector<8x32xf32>
    %cst_7 = arith.constant 9.99999974E-6 : f32
    %17 = vector.broadcast %cst_7 : f32 to vector<8x1xf32>
    %18 = arith.addf %14, %17 : vector<8x1xf32>
    %19 = math.rsqrt %18 : vector<8x1xf32>
    %20 = vector.broadcast %19 : vector<8x1xf32> to vector<8x32xf32>
    %21 = arith.mulf %16, %20 : vector<8x32xf32>
    %c0_8 = arith.constant 0 : index
    %c0_9 = arith.constant 0 : index
    %22 = vector.load %arg3[%c0_8, %c0_9] : memref<1x32xf32, #tpu.memory_space<vmem>>, vector<1x32xf32>
    %23 = vector.broadcast %22 : vector<1x32xf32> to vector<8x32xf32>
    %24 = arith.mulf %21, %23 : vector<8x32xf32>
    %c0_10 = arith.constant 0 : index
    %c0_11 = arith.constant 0 : index
    %25 = vector.load %arg4[%c0_10, %c0_11] : memref<1x32xf32, #tpu.memory_space<vmem>>, vector<1x32xf32>
    %26 = vector.broadcast %25 : vector<1x32xf32> to vector<8x32xf32>
    %27 = arith.addf %24, %26 : vector<8x32xf32>
    %c0_12 = arith.constant 0 : index
    %c0_13 = arith.constant 0 : index
    %c0_14 = arith.constant 0 : index
    %28 = vector.load %arg5[%c0_12, %c0_13, %c0_14] : memref<1x8x32xf32, #tpu.memory_space<vmem>>, vector<1x8x32xf32>
    %29 = vector.shape_cast %28 : vector<1x8x32xf32> to vector<8x32xf32>
    %30 = vector.shape_cast %27 : vector<8x32xf32> to vector<1x8x32xf32>
    tpu.vector_store %arg5[%c0_12, %c0_13, %c0_14], %30 {strides = array<i32>} : memref<1x8x32xf32, #tpu.memory_space<vmem>>, vector<1x8x32xf32>,
    return
  }
  func.func @transform_0(%arg0: i32) -> (i32, i32, i32) {
    %c0_i32 = arith.constant 0 : i32
    %c0_i32_0 = arith.constant 0 : i32
    %c0_i32_1 = arith.constant 0 : i32
    return %arg0, %c0_i32, %c0_i32_0 : i32, i32, i32
  }
  func.func @transform_1(%arg0: i32) -> (i32, i32) {
    %c0_i32 = arith.constant 0 : i32
    %c0_i32_0 = arith.constant 0 : i32
    %c0_i32_1 = arith.constant 0 : i32
    return %c0_i32, %c0_i32_0 : i32, i32
  }
  func.func @transform_2(%arg0: i32) -> (i32, i32) {
    %c0_i32 = arith.constant 0 : i32
    %c0_i32_0 = arith.constant 0 : i32
    %c0_i32_1 = arith.constant 0 : i32
    return %c0_i32, %c0_i32_0 : i32, i32
  }
  func.func @transform_3(%arg0: i32) -> (i32, i32) {
    %c0_i32 = arith.constant 0 : i32
    %c0_i32_0 = arith.constant 0 : i32
    %c0_i32_1 = arith.constant 0 : i32
    return %c0_i32, %c0_i32_0 : i32, i32
  }
  func.func @transform_4(%arg0: i32) -> (i32, i32, i32) {
    %c0_i32 = arith.constant 0 : i32
    %c0_i32_0 = arith.constant 0 : i32
    %c0_i32_1 = arith.constant 0 : i32
    return %arg0, %c0_i32, %c0_i32_0 : i32, i32, i32
  }
}

</mosaic_0001>

<bundles_post_ra>
// kernel: tpu_custom_call.1
= control target key start
LH: loop header
LB: loop body
LE: loop exit
PB: predicated region body
PF: predicated region fallthrough
CT: control target
= control target key end

     0   :  { %9 = vsyncpa [#allocation3], 0  ;;  %s756_s0 = inlined_call_operand.hbm [shape: f32[4,8,32], index: 0, kind: input, shape index: {}]   ;;  %s757_s1 = inlined_call_operand.hbm [shape: f32[8,32], index: 1, kind: input, shape index: {}]   ;;  %s758_s2 = inlined_call_operand.vmem [shape: f32[1,32], index: 2, kind: input, shape index: {}]   ;;  %s759_s3 = inlined_call_operand.vmem [shape: f32[1,32], index: 3, kind: input, shape index: {}]   ;;  %s760_s4 = inlined_call_operand.hbm [shape: f32[4,8,32], index: 4, kind: output, shape index: {}]  }
   0x1   :  { %11 = vsyncpa [#allocation3 + $0x1], 0 }
   0x2   :  { %12 = vsyncpa [#allocation6], 0 }
   0x3   :  { %13 = vsyncpa [#allocation4], 0 }
   0x4   :  { %15 = vsyncpa [#allocation4 + $0x1], 0  ;;  %s607_s15 = smov 0   ;;  %s609_s16 = smov 0  }
   0x5   :  { %s611_s17 = smov 0   ;;  %s613_s18 = smov 0  }
   0x6 LB: > { %s628_s19 = sadd.s32 4294967295, %s578_s18   ;;  %s370_s20 = sadd.s32 4294967294, %s578_s18   ;;  %s578_s18 = sphi %s613_s18, %s769_s18   ;;  %s574_s17 = sphi %s611_s17, %s768_s17   ;;  %s570_s16 = sphi %s609_s16, %s767_s16   ;;  %s566_s15 = sphi %s607_s15, %s766_s15  }
   0x7   : > { %p41_p0 = scmp.ne.s32.totalorder %s570_s16, %s566_s15  ;;  %p42_p1 = scmp.eq.s32.totalorder %s628_s19, 0 }
   0x8   : > { %p128_p2 = scmp.eq.s32.totalorder %s628_s19, 3  ;;  %p134_p3 = scmp.eq.s32.totalorder %s370_s20, 3 }
   0x9   : > { %p637_p4 = por %p42_p1, %p41_p0  ;;  %p371_p5 = scmp.ge.s32.totalorder %s578_s18, 1 }
   0xa   : > { %p642_p6 = por %p134_p3, %p41_p0  ;;  %p141_p7 = scmp.lt.s32.totalorder %s578_s18, 5 }
   0xb   : > { %s153_s25 = sshll.u32 %s757_s1, 4  ;;  %s580_s27 = smov [#allocation5]   ;;  %s154_s25 = int_to_ptr.hbm [resolvable:$true] %s153_s25 }
   0xc   : > { %p650_p8 = pnand %p371_p5, %p141_p7  ;;  %s155_s28 = sshll.u32 %s580_s27, 4  ;;  %s156_s28 = int_to_ptr.vmem [resolvable:$true] %s155_s28 }
   0xd   : > { %s659_s29 = sadd.s32 1, %s578_s18   ;;  %s28_s30 = sadd.s32 1, %s574_s17 }
   0xe   : > { %p392_p9 = pneg %p650_p8  ;;  %s25_s5 = ssub.s32 %s578_s18, %s659_s29 }
   0xf   : > { %p26_p11 = scmp.eq.s32.totalorder %s25_s5, 0  ;;  %p35_p12 = scmp.ne.s32.totalorder %s574_s17, %s570_s16 }
  0x10   : > { %p393_p10 = pnand %p392_p9, %p42_p1  ;;  %p36_p13 = scmp.eq.s32.totalorder %s578_s18, 0 }
  0x11   : > { %s668_s6 = scalar_select %p26_p11, %s574_s17, %s28_s30  }
  0x12   : > { %395 = dma.hbm_to_vmem [thread:$0]  (!%p393_p10), %s154_s25, 128, %s156_s28, [#allocation6]  }
  0x13   : > { %p672_p0 = por %p128_p2, %p35_p12  ;;  %p405_p3 = scmp.lt.s32.totalorder %s578_s18, 4 }
  0x14   : > { %s172_s8 = sand.u32 1, %s574_s17   ;;  %s375_s9 = sshll.u32 %s578_s18, 3 }
  0x15   : > { %p37_p5 = por %p36_p13, %p35_p12  ;;  %s374_s10 = sshll.u32 %s172_s8, 3 }
  0x16   : > { %s180_s13 = scalar_lea.hbm %s756_s0, %s375_s9  ;;  %s176_s20 = scalar_lea.vmem [#allocation2], %s374_s10 }
  0x17   : > { %s182_s14 = sshll.u32 %s180_s13, 4  ;;  %s184_s23 = sshll.u32 %s176_s20, 4  ;;  %s183_s14 = int_to_ptr.hbm [resolvable:$true] %s182_s14  ;;  %s185_s23 = int_to_ptr.vmem [resolvable:$true] %s184_s23 }
  0x18   : > { %p682_p7 = pnand %p405_p3, %p37_p5  ;;  %s173_s25 = scalar_lea.sflag [#allocation3], %s172_s8 }
  0x19   : > { %s478_s27 = sshra.s32 %s183_s14, 4  ;;  %s485_s9 = scalar_lea.hbm %s756_s0, 32  ;;  %s479_s27 = int_to_ptr.hbm [resolvable:$true] %s478_s27 }
  0x1a   : > { %s480_s28 = scalar_lea.hbm %s479_s27, 8  ;;  %p482_p9 = pneg %p682_p7 }
  0x1b   : > { %p481_p2 = scmp.ne.s32.totalorder %s479_s27, %s480_s28  ;;  %p486_p12 = scmp.lt.s32.totalorder %s479_s27, %s756_s0 }
  0x1c   : > { %p487_p13 = scmp.lt.s32.totalorder %s485_s9, %s480_s28 }
  0x1d   : > { %p483_p10 = pnand %p482_p9, %p481_p2 }
  0x1e   : > { %p488_p3 = por %p487_p13, %p486_p12 }
  0x1f   : > { %p484_p11 = pneg %p483_p10 }
  0x21   : > { %p489_p5 = pnand %p488_p3, %p484_p11 }
  0x23   : > { %492 = shalt.err (!%p489_p5)
}
  0x24   : > { %399 = dma.hbm_to_vmem [thread:$0]  (!%p682_p7), %s183_s14, 128, %s185_s23, %s173_s25  }
  0x25   : > { %193 = sbr.rel (%p650_p8) target bundleno = 319 (0x13f), region = 36  ;;  %s699_s8 = sand.u32 (!%p650_p8), 1, %s570_s16  }
  0x26   : > { %s377_s12 = sshll.u32 (!%p650_p8), %s699_s8, 3  ;;  %s196_s13 = scalar_lea.sflag (!%p650_p8), [#allocation3], %s699_s8 }
  0x27   : > { %s199_s20 = scalar_lea.vmem (!%p650_p8), [#allocation2], %s377_s12 }
  0x2a   : > { %553 = dma.done.wait (%p637_p4), %s196_s13, 128  }
  0x2b   : > { %555 = vsyncadd (%p637_p4), %s196_s13, 4294967168 }
  0x2c   : > { %557 = dma.done.wait (%p42_p1), [#allocation6], 128  }
  0x2d   : > { %559 = vsyncadd (%p42_p1), [#allocation6], 4294967168  ;;  %v230_v0 = vld [vmem:[%s199_s20] sm:$0xff]  ;;  %v231_v1 = vld [vmem:[#allocation5] sm:$0xff]  ;;  %vm233_vm0 = vcmask 261120   ;;  %v581_v4 = vmov 32.0  }
  0x2e   : > { %v232_v2 = vadd.f32 %v231_v1, %v230_v0  ;;  %444 = vrcp.f32 %v581_v4  ;;  %s381_s21 = sshll.u32 %s628_s19, 3  ;;  %v442_v25 = vld [vmem:[%s758_s2] ss:$0 sm:$0xff]  ;;  %s229_s19 = scalar_lea.vmem [#allocation7], %s377_s12 }
  0x2f   : > { %s285_s25 = scalar_lea.hbm %s760_s4, %s381_s21  ;;  %v443_v28 = vld [vmem:[%s759_s3] ss:$0 sm:$0xff]  ;;  %s287_s30 = sshll.u32 %s229_s19, 4  ;;  %s288_s30 = int_to_ptr.vmem [resolvable:$true] %s287_s30 }
  0x30   : > { %v234_v3 = vsel %vm233_vm0, %v232_v2, 0.0  ;;  %s289_s5 = sshll.u32 %s285_s25, 4  ;;  %s275_s9 = scalar_lea.sflag [#allocation4], %s699_s8  ;;  %s290_s5 = int_to_ptr.hbm [resolvable:$true] %s289_s5 }
  0x31   : > { %235 = vadd.xlane.f32.xlu0 %v234_v3  ;;  %s522_s10 = sshra.s32 %s290_s5, 4  ;;  %s528_s12 = scalar_lea.hbm %s760_s4, 32  ;;  %s523_s10 = int_to_ptr.hbm [resolvable:$true] %s522_s10 }
  0x32   : > { %s524_s11 = scalar_lea.hbm %s523_s10, 8  ;;  %p529_p7 = scmp.lt.s32.totalorder %s523_s10, %s760_s4 }
  0x33   : > { %p525_p1 = scmp.ne.s32.totalorder %s523_s10, %s524_s11  ;;  %p530_p2 = scmp.lt.s32.totalorder %s528_s12, %s524_s11 }
  0x34   : > { %v445_v5 = vpop.eup %444 }
  0x35   : > { %v238_v6 = vmul.f32 32.0, %v445_v5  ;;  %vm242_vm1 = vweird.f32 %v445_v5  ;;  %p526_p4 = pnand %p525_p1, %p672_p0  ;;  %p531_p9 = por %p530_p2, %p529_p7 }
  0x37   : > { %v239_v7 = vsub.f32 1.0, %v238_v6  ;;  %p527_p8 = pneg %p526_p4 }
  0x39   : > { %v240_v8 = vmul.f32 %v445_v5, %v239_v7  ;;  %p532_p10 = pnand %p531_p9, %p527_p8 }
  0x3b   : > { %v241_v9 = vadd.f32 %v445_v5, %v240_v8 }
  0x3d   : > { %v243_v10 = vsel %vm242_vm1, %v445_v5, %v241_v9 }
  0xa4   : > { %v236_v11 = vpop.xlane.xlu0 %235 }
  0xa5   : > { %v244_v12 = vmul.f32 %v243_v10, %v236_v11 }
  0xa7   : > { %v245_v13 = vsub.f32 %v232_v2, %v244_v12 }
  0xa9   : > { %v246_v14 = vmul.f32 %v245_v13, %v245_v13 }
  0xab   : > { %v247_v15 = vsel %vm233_vm0, %v246_v14, 0.0 }
  0xac   : > { %248 = vadd.xlane.f32.xlu0 %v247_v15 }
 0x11f   : > { %v249_v16 = vpop.xlane.xlu0 %248 }
 0x120   : > { %v250_v17 = vmul.f32 %v249_v16, %v243_v10 }
 0x122   : > { %v251_v18 = vadd.f32 1e-05, %v250_v17 }
 0x124   : > { %446 = vrsqrt.f32 %v251_v18  ;;  %vm258_vm3 = vweird.f32 %v251_v18 }
 0x12a   : > { %v447_v19 = vpop.eup %446 }
 0x12b   : > { %v253_v20 = vmul.f32 %v447_v19, %v251_v18  ;;  %vm259_vm2 = vweird.f32 %v447_v19 }
 0x12c   : > { %vm260_vm4 = vmor %vm258_vm3, %vm259_vm2 }
 0x12d   : > { %v254_v21 = vmul.f32 %v447_v19, %v253_v20 }
 0x12f   : > { %v255_v22 = vmul.f32 0.5, %v254_v21 }
 0x131   : > { %v256_v23 = vsub.f32 1.5, %v255_v22 }
 0x133   : > { %v257_v24 = vmul.f32 %v447_v19, %v256_v23 }
 0x135   : > { %v261_v26 = vsel %vm260_vm4, %v447_v19, %v257_v24 }
 0x136   : > { %v262_v27 = vmul.f32 %v261_v26, %v245_v13 }
 0x138   : > { %v267_v29 = vmul.f32 %v442_v25, %v262_v27 }
 0x13a   : > { %v272_v30 = vadd.f32 %v443_v28, %v267_v29 }
 0x13c   : > { %273 = vst.msk [vmem:[%s229_s19] sm:$0xff] %vm233_vm0, %v272_v30 }
 0x13d   : > { %535 = shalt.err (!%p532_p10)
}
 0x13e   : > { %390 = dma.vmem_to_hbm [thread:$0]  (%p672_p0), %s288_s30, 128, %s290_s5, %s275_s9  }
 0x13f PF: > { %p407_p11 = scmp.ge.s32.totalorder %s578_s18, 2  ;;  %s301_s8 = sand.u32 1, %s566_s15  }
 0x140   : > { %s302_s14 = scalar_lea.sflag [#allocation4], %s301_s8 }
 0x141   : > { %p401_p12 = pnand %p407_p11, %p642_p6 }
 0x143   : > { %p402_p13 = pneg %p401_p12 }
 0x145   : > { %561 = dma.done.wait (%p402_p13), %s302_s14, 128  }
 0x146   : > { %563 = vsyncadd (%p402_p13), %s302_s14, 4294967168  ;;  %p18_p3 = scmp.ge.s32.totalorder %s659_s29, 6   ;;  %s766_s15 = smov %s570_s16 }
 0x147   : > { %s767_s16 = smov %s574_s17  ;;  %s768_s17 = smov %s668_s6 }
 0x148   : > { %s769_s18 = smov %s659_s29  ;;  %20 = sbr.rel (!%p18_p3) target bundleno = 6 (0x6), region = 85 }
 0x14d   :  { %308 = vsyncpa [#allocation3], 1 }
 0x14e   :  { %310 = vsyncpa [#allocation3 + $0x1], 1 }
 0x14f   :  { %311 = vsyncpa [#allocation6], 1 }
 0x150   :  { %312 = vsyncpa [#allocation4], 1 }
 0x151   :  { %314 = vsyncpa [#allocation4 + $0x1], 1 }

</bundles_post_ra>
